<compile_context>
chip_gen: v6e
topology: v6e:2x2x1
jax: 0.10.0
libtpu: 0.0.40
codegen_flags: <defaults>
</compile_context>

<pallas_src>
import jax
import jax.numpy as jnp
from jax.experimental import pallas as pl
from jax.experimental.pallas import tpu as pltpu


def mlp_attention_kernel(x_ref, h_ref, w0_ref, w1_ref, wb_ref, out_ref):
    # x_ref:  (Bt, S, H)  sequence inputs for this batch block
    # h_ref:  (Bt, H)     query vectors for this batch block
    # w0_ref: (H, H), w1_ref: (H, H), wb_ref: (1, H)  (W_b passed as a row)
    # out_ref:(Bt, H)
    bt, s, hdim = x_ref.shape
    x = x_ref[...]                                     # (Bt, S, H)

    # One fused MXU matmul over all Bt*S rows, plus the (Bt, H) query matmul.
    x2 = x.reshape(bt * s, hdim)                       # contiguous collapse
    m = jnp.dot(x2, w0_ref[...], preferred_element_type=jnp.float32)
    hw = jnp.dot(h_ref[...], w1_ref[...], preferred_element_type=jnp.float32)
    m = m.reshape(bt, s, hdim) + hw[:, None, :]        # broadcast query over S
    m = jnp.tanh(m)

    # Attention scores on the VPU/XLU (not an N=1 MXU matmul):
    # u[b, s] = sum_h M[b, s, h] * W_b[h]
    u = jnp.sum(m * wb_ref[...], axis=-1, keepdims=True)   # (Bt, S, 1)

    # Softmax over the sequence axis.
    u_max = jnp.max(u, axis=1, keepdims=True)
    e = jnp.exp(u - u_max)
    denom = jnp.sum(e, axis=1, keepdims=True)               # (Bt, 1, 1)
    alpha = e * pl.reciprocal(denom, approx=True)

    # 'sum' pooling: sum_s alpha[b, s] * x[b, s, :]  -> (Bt, H), lane-dense store.
    pooled = jnp.sum(x * alpha, axis=1)
    out_ref[...] = pooled.astype(out_ref.dtype)


def mlp_attention_layer(x, h, w0, w1, wb, *, bt=None):
    """x: (B, S, H), h: (B, H). Returns (B, H) = sum-pooled attention output."""
    B, S, H = x.shape

    # Choose a batch block so Bt*S rows feed the MXU efficiently (~256 rows),
    # sublane-aligned (multiple of 8) when it does not cover the whole batch.
    if bt is None:
        target = max(1, 256 // max(S, 1))
        if target >= B:
            bt = B
        else:
            bt = max(8, (target // 8) * 8)

    pad = (-B) % bt
    if pad:
        # Zero-padded rows produce zero pooled output (no NaNs) and are sliced off.
        x = jnp.pad(x, ((0, pad), (0, 0), (0, 0)))
        h = jnp.pad(h, ((0, pad), (0, 0)))
    Bp = B + pad

    wb_row = wb.reshape(1, H)   # W_b as a lane-dense row for the VPU score path

    out = pl.pallas_call(
        mlp_attention_kernel,
        out_shape=jax.ShapeDtypeStruct((Bp, H), x.dtype),
        grid_spec=pltpu.PrefetchScalarGridSpec(
            num_scalar_prefetch=0,
            grid=(Bp // bt,),
            in_specs=[
                pl.BlockSpec((bt, S, H), lambda b: (b, 0, 0)),   # x batch block
                pl.BlockSpec((bt, H), lambda b: (b, 0)),         # h batch block
                pl.BlockSpec((H, H), lambda b: (0, 0)),          # W_0 (grid-invariant)
                pl.BlockSpec((H, H), lambda b: (0, 0)),          # W_1 (grid-invariant)
                pl.BlockSpec((1, H), lambda b: (0, 0)),          # W_b row (grid-invariant)
            ],
            out_specs=pl.BlockSpec((bt, H), lambda b: (b, 0)),   # lane-dense output slab
        ),
        compiler_params=pltpu.CompilerParams(
            dimension_semantics=("parallel",),
            vmem_limit_bytes=64 * 1024 * 1024,
        ),
    )(x, h, w0, w1, wb_row)

    if pad:
        out = out[:B]
    return out


def mlp_attention_ref(x, h, w0, w1, wb):
    """Pure-JAX reference mirroring the PyTorch forward (pooling='sum')."""
    m = jnp.einsum("bsh,hk->bsk", x, w0) + (h @ w1)[:, None, :]
    m = jnp.tanh(m)
    u = jnp.einsum("bsh,ho->bso", m, wb)          # (B, S, 1)
    alpha = jax.nn.softmax(u, axis=1)
    return jnp.sum(x * alpha, axis=1)             # (B, H)


if __name__ == "__main__":
    B, S, H = 2, 8, 32
    key = jax.random.PRNGKey(0)
    kx, kh, k0, k1, kb = jax.random.split(key, 5)

    x = jax.random.normal(kx, (B, S, H), dtype=jnp.float32)
    h = jax.random.normal(kh, (B, H), dtype=jnp.float32)

    # Deterministic parameter init mirroring reset_parameters(): uniform(-0.1, 0.1)
    stdv = 0.1
    w0 = jax.random.uniform(k0, (H, H), minval=-stdv, maxval=stdv, dtype=jnp.float32)
    w1 = jax.random.uniform(k1, (H, H), minval=-stdv, maxval=stdv, dtype=jnp.float32)
    wb = jax.random.uniform(kb, (H, 1), minval=-stdv, maxval=stdv, dtype=jnp.float32)

    out = mlp_attention_layer(x, h, w0, w1, wb)
    out = jax.block_until_ready(out)

    ref = mlp_attention_ref(x, h, w0, w1, wb)
    assert out.shape == (B, H)
    # approx=True reciprocal in the softmax -> slightly looser tolerance.
    assert jnp.allclose(out, ref, atol=1e-3, rtol=1e-3), (
        f"max abs diff {jnp.max(jnp.abs(out - ref))}")

    print("KERNEL_OK")
</pallas_src>

<mosaic_0001>
module attributes {stable_mosaic.version = 11 : i64} {
  func.func @mlp_attention_kernel(%arg0: i32, %arg1: memref<2x8x32xf32, #tpu.memory_space<vmem>>, %arg2: memref<2x32xf32, #tpu.memory_space<vmem>>, %arg3: memref<32x32xf32, #tpu.memory_space<vmem>>, %arg4: memref<32x32xf32, #tpu.memory_space<vmem>>, %arg5: memref<1x32xf32, #tpu.memory_space<vmem>>, %arg6: memref<2x32xf32, #tpu.memory_space<vmem>>) attributes {dimension_semantics = [#tpu.dimension_semantics<parallel>], iteration_bounds = array<i64: 1>, scalar_prefetch = 0 : i64, scratch_operands = 0 : i64, tpu.core_type = #tpu.core_type<tc>, window_params = [{transform_indices = @transform_0, window_bounds = array<i64: 2, 8, 32>}, {transform_indices = @transform_1, window_bounds = array<i64: 2, 32>}, {pipeline_mode = #tpu.pipeline_mode<synchronous>, transform_indices = @transform_2, window_bounds = array<i64: 32, 32>}, {pipeline_mode = #tpu.pipeline_mode<synchronous>, transform_indices = @transform_3, window_bounds = array<i64: 32, 32>}, {pipeline_mode = #tpu.pipeline_mode<synchronous>, transform_indices = @transform_4, window_bounds = array<i64: 1, 32>}, {transform_indices = @transform_5, window_bounds = array<i64: 2, 32>}]} {
    %c0 = arith.constant 0 : index
    %c0_0 = arith.constant 0 : index
    %c0_1 = arith.constant 0 : index
    %0 = vector.load %arg1[%c0, %c0_0, %c0_1] : memref<2x8x32xf32, #tpu.memory_space<vmem>>, vector<2x8x32xf32>
    %1 = vector.shape_cast %0 : vector<2x8x32xf32> to vector<16x32xf32>
    %c0_2 = arith.constant 0 : index
    %c0_3 = arith.constant 0 : index
    %2 = vector.load %arg3[%c0_2, %c0_3] : memref<32x32xf32, #tpu.memory_space<vmem>>, vector<32x32xf32>
    %cst = arith.constant dense<0.000000e+00> : vector<16x32xf32>
    %3 = tpu.matmul %1, %2, %cst {dimension_numbers = #tpu.dot_dimension_numbers<[1], [0], [0], [1], [0, 0, 1, 1], [], []>} : vector<16x32xf32>, vector<32x32xf32>, vector<16x32xf32> -> vector<16x32xf32>
    %c0_4 = arith.constant 0 : index
    %c0_5 = arith.constant 0 : index
    %4 = vector.load %arg2[%c0_4, %c0_5] : memref<2x32xf32, #tpu.memory_space<vmem>>, vector<2x32xf32>
    %c0_6 = arith.constant 0 : index
    %c0_7 = arith.constant 0 : index
    %5 = vector.load %arg4[%c0_6, %c0_7] : memref<32x32xf32, #tpu.memory_space<vmem>>, vector<32x32xf32>
    %cst_8 = arith.constant dense<0.000000e+00> : vector<2x32xf32>
    %6 = tpu.matmul %4, %5, %cst_8 {dimension_numbers = #tpu.dot_dimension_numbers<[1], [0], [0], [1], [0, 0, 1, 1], [], []>} : vector<2x32xf32>, vector<32x32xf32>, vector<2x32xf32> -> vector<2x32xf32>
    %7 = vector.shape_cast %3 : vector<16x32xf32> to vector<2x8x32xf32>
    %8 = vector.shape_cast %6 : vector<2x32xf32> to vector<2x1x32xf32>
    %9 = vector.broadcast %8 : vector<2x1x32xf32> to vector<2x8x32xf32>
    %10 = arith.addf %7, %9 : vector<2x8x32xf32>
    %11 = math.tanh %10 : vector<2x8x32xf32>
    %c0_9 = arith.constant 0 : index
    %c0_10 = arith.constant 0 : index
    %12 = vector.load %arg5[%c0_9, %c0_10] : memref<1x32xf32, #tpu.memory_space<vmem>>, vector<1x32xf32>
    %13 = vector.shape_cast %12 : vector<1x32xf32> to vector<1x1x32xf32>
    %14 = vector.broadcast %13 : vector<1x1x32xf32> to vector<2x8x32xf32>
    %15 = arith.mulf %11, %14 : vector<2x8x32xf32>
    %cst_11 = arith.constant dense<0.000000e+00> : vector<2x8xf32>
    %16 = vector.multi_reduction <add>, %15, %cst_11 [2] : vector<2x8x32xf32> to vector<2x8xf32>
    %17 = vector.shape_cast %16 : vector<2x8xf32> to vector<2x8x1xf32>
    %cst_12 = arith.constant dense<0xFF800000> : vector<2x1xf32>
    %18 = vector.multi_reduction <maximumf>, %17, %cst_12 [1] : vector<2x8x1xf32> to vector<2x1xf32>
    %19 = vector.shape_cast %18 : vector<2x1xf32> to vector<2x1x1xf32>
    %20 = vector.broadcast %19 : vector<2x1x1xf32> to vector<2x8x1xf32>
    %21 = arith.subf %17, %20 : vector<2x8x1xf32>
    %22 = math.exp %21 : vector<2x8x1xf32>
    %cst_13 = arith.constant dense<0.000000e+00> : vector<2x1xf32>
    %23 = vector.multi_reduction <add>, %22, %cst_13 [1] : vector<2x8x1xf32> to vector<2x1xf32>
    %24 = vector.shape_cast %23 : vector<2x1xf32> to vector<2x1x1xf32>
    %25 = tpu.reciprocal %24 {approx = true} : vector<2x1x1xf32> -> vector<2x1x1xf32>
    %26 = vector.broadcast %25 : vector<2x1x1xf32> to vector<2x8x1xf32>
    %27 = arith.mulf %22, %26 : vector<2x8x1xf32>
    %28 = vector.broadcast %27 : vector<2x8x1xf32> to vector<2x8x32xf32>
    %29 = arith.mulf %0, %28 : vector<2x8x32xf32>
    %cst_14 = arith.constant dense<0.000000e+00> : vector<2x32xf32>
    %30 = vector.multi_reduction <add>, %29, %cst_14 [1] : vector<2x8x32xf32> to vector<2x32xf32>
    %c0_15 = arith.constant 0 : index
    %c0_16 = arith.constant 0 : index
    %31 = vector.load %arg6[%c0_15, %c0_16] : memref<2x32xf32, #tpu.memory_space<vmem>>, vector<2x32xf32>
    tpu.vector_store %arg6[%c0_15, %c0_16], %30 {strides = array<i32>} : memref<2x32xf32, #tpu.memory_space<vmem>>, vector<2x32xf32>,
    return
  }
  func.func @transform_0(%arg0: i32) -> (i32, i32, i32) {
    %c0_i32 = arith.constant 0 : i32
    %c0_i32_0 = arith.constant 0 : i32
    %c0_i32_1 = arith.constant 0 : i32
    return %arg0, %c0_i32, %c0_i32_0 : i32, i32, i32
  }
  func.func @transform_1(%arg0: i32) -> (i32, i32) {
    %c0_i32 = arith.constant 0 : i32
    %c0_i32_0 = arith.constant 0 : i32
    return %arg0, %c0_i32 : i32, i32
  }
  func.func @transform_2(%arg0: i32) -> (i32, i32) {
    %c0_i32 = arith.constant 0 : i32
    %c0_i32_0 = arith.constant 0 : i32
    %c0_i32_1 = arith.constant 0 : i32
    return %c0_i32, %c0_i32_0 : i32, i32
  }
  func.func @transform_3(%arg0: i32) -> (i32, i32) {
    %c0_i32 = arith.constant 0 : i32
    %c0_i32_0 = arith.constant 0 : i32
    %c0_i32_1 = arith.constant 0 : i32
    return %c0_i32, %c0_i32_0 : i32, i32
  }
  func.func @transform_4(%arg0: i32) -> (i32, i32) {
    %c0_i32 = arith.constant 0 : i32
    %c0_i32_0 = arith.constant 0 : i32
    %c0_i32_1 = arith.constant 0 : i32
    return %c0_i32, %c0_i32_0 : i32, i32
  }
  func.func @transform_5(%arg0: i32) -> (i32, i32) {
    %c0_i32 = arith.constant 0 : i32
    %c0_i32_0 = arith.constant 0 : i32
    return %arg0, %c0_i32 : i32, i32
  }
}

</mosaic_0001>

<bundles_post_ra>
// kernel: tpu_custom_call.1
= control target key start
LH: loop header
LB: loop body
LE: loop exit
PB: predicated region body
PF: predicated region fallthrough
CT: control target
= control target key end

     0   :  { %10 = vsyncpa [#allocation3], 0  ;;  %s606_s0 = inlined_call_operand.hbm [shape: f32[2,8,32], index: 0, kind: input, shape index: {}]   ;;  %s607_s1 = inlined_call_operand.hbm [shape: f32[2,32], index: 1, kind: input, shape index: {}]   ;;  %s608_s2 = inlined_call_operand.hbm [shape: f32[32,32], index: 2, kind: input, shape index: {}]   ;;  %s609_s3 = inlined_call_operand.hbm [shape: f32[32,32], index: 3, kind: input, shape index: {}]   ;;  %s610_s4 = inlined_call_operand.vmem [shape: f32[1,32], index: 4, kind: input, shape index: {}]   ;;  %s611_s5 = inlined_call_operand.hbm [shape: f32[2,32], index: 5, kind: output, shape index: {}]  }
   0x1   :  { %11 = vsyncpa [#allocation6], 0 }
   0x2   :  { %12 = vsyncpa [#allocation9], 0 }
   0x3   :  { %13 = vsyncpa [#allocation4], 0  ;;  %s533_s18 = smov [#allocation5]   ;;  %s534_s20 = smov [#allocation2]  }
   0x4   :  { %s32_s19 = sshll.u32 %s533_s18, 4  ;;  %s19_s21 = sshll.u32 %s534_s20, 4  ;;  %s33_s19 = int_to_ptr.vmem [resolvable:$true] %s32_s19  ;;  %s20_s21 = int_to_ptr.vmem [resolvable:$true] %s19_s21 }
   0x5   :  { %s433_s22 = scalar_lea.vmem %s33_s19, 32  ;;  %p438_p1 = scmp.lt.s32.totalorder %s33_s19, %s33_s19 }
   0x6   :  { %p434_p0 = scmp.ne.s32.totalorder %s33_s19, %s433_s22  ;;  %p439_p2 = scmp.lt.s32.totalorder %s433_s22, %s433_s22 }
   0x8   :  { %p440_p3 = por %p439_p2, %p438_p1 }
   0xa   :  { %p441_p4 = pnand %p440_p3, %p434_p0 }
   0xc   :  { %444 = shalt.err (!%p441_p4)
}
   0xd   :  { %35 = dma.hbm_to_vmem [thread:$0]  %s607_s1, 32, %s33_s19, [#allocation6]  }
   0xe   :  { %s453_s25 = scalar_lea.vmem %s20_s21, 256  ;;  %p458_p6 = scmp.lt.s32.totalorder %s20_s21, %s20_s21 }
   0xf   :  { %p454_p5 = scmp.ne.s32.totalorder %s20_s21, %s453_s25  ;;  %p459_p7 = scmp.lt.s32.totalorder %s453_s25, %s453_s25 }
  0x11   :  { %p460_p8 = por %p459_p7, %p458_p6 }
  0x13   :  { %p461_p9 = pnand %p460_p8, %p454_p5 }
  0x15   :  { %464 = shalt.err (!%p461_p9)
}
  0x16   :  { %s535_s26 = smov 128   ;;  %s536_s27 = smov 8  }
  0x17   :  { %25 = dma.hbm_to_vmem [thread:$0]  %s606_s0, 256, %s20_s21, [#allocation3], %s535_s26, %s535_s26, %s536_s27  }
  0x18   :  { %s537_s30 = smov [#allocation7]   ;;  %s538_s7 = smov [#allocation8]  }
  0x19   :  { %s41_s6 = sshll.u32 %s537_s30, 4  ;;  %s53_s8 = sshll.u32 %s538_s7, 4  ;;  %s42_s6 = int_to_ptr.vmem [resolvable:$true] %s41_s6  ;;  %s54_s8 = int_to_ptr.vmem [resolvable:$true] %s53_s8 }
  0x1a   :  { %s473_s1 = scalar_lea.vmem %s42_s6, 512  ;;  %p478_p11 = scmp.lt.s32.totalorder %s42_s6, %s42_s6 }
  0x1b   :  { %p474_p10 = scmp.ne.s32.totalorder %s42_s6, %s473_s1  ;;  %p479_p12 = scmp.lt.s32.totalorder %s473_s1, %s473_s1 }
  0x1d   :  { %p480_p13 = por %p479_p12, %p478_p11 }
  0x1f   :  { %p481_p0 = pnand %p480_p13, %p474_p10 }
  0x21   :  { %484 = shalt.err (!%p481_p0)
}
  0x22   :  { %47 = dma.hbm_to_vmem [thread:$0]  %s608_s2, 512, %s42_s6, [#allocation6], %s535_s26, %s535_s26, %s536_s27  }
  0x23   :  { %s493_s11 = scalar_lea.vmem %s54_s8, 512  ;;  %p498_p2 = scmp.lt.s32.totalorder %s54_s8, %s54_s8 }
  0x24   :  { %p494_p1 = scmp.ne.s32.totalorder %s54_s8, %s493_s11  ;;  %p499_p3 = scmp.lt.s32.totalorder %s493_s11, %s493_s11 }
  0x26   :  { %p500_p4 = por %p499_p3, %p498_p2 }
  0x28   :  { %p501_p5 = pnand %p500_p4, %p494_p1 }
  0x2a   :  { %504 = shalt.err (!%p501_p5)
}
  0x2b   :  { %59 = dma.hbm_to_vmem [thread:$0]  %s609_s3, 512, %s54_s8, [#allocation9], %s535_s26, %s535_s26, %s536_s27  }
  0x2c   :  { %525 = dma.done.wait [#allocation3], 256  }
  0x2d   :  { %526 = vsyncadd [#allocation3], 4294967040 }
  0x2e   :  { %527 = dma.done.wait [#allocation6], 544  }
  0x2f   :  { %528 = vsyncadd [#allocation6], 4294966752 }
  0x30   :  { %529 = dma.done.wait [#allocation9], 512  }
  0x31   :  { %530 = vsyncadd [#allocation9], 4294966784  ;;  %v539_v0 = vmov 0.0   ;;  %vm540_vm0 = vmmov 0   ;;  %v166_v1 = vld [vmem:[#allocation8 + $0x18] sm:$0xff]  ;;  %v165_v3 = vld [vmem:[#allocation8 + $0x10] sm:$0xff]  ;;  %v244_v14 = vlaneseq }
  0x32   :  { %392 = vmatprep.subr.mxu1 %v539_v0  ;;  %400 = vmatprep.mubr.msk.f32.mxu1 %vm540_vm0, %v539_v0  ;;  %v79_v2 = vld [vmem:[#allocation7 + $0x18] sm:$0xff]  ;;  %v78_v4 = vld [vmem:[#allocation7 + $0x10] sm:$0xff]  ;;  %v164_v5 = vld [vmem:[#allocation8 + $0x8] sm:$0xff]  ;;  %vm80_vm1 = vcmask 261120   ;;  %v541_v12 = vmov 1966171168  }
  0x33   :  { %393 = vmatpush3.msra.mxu1 %v166_v1  ;;  %381 = vmatprep.subr.mxu0 %v79_v2  ;;  %v77_v6 = vld [vmem:[#allocation7 + $0x8] sm:$0xff]  ;;  %v163_v7 = vld [vmem:[#allocation8] sm:$0xff]  ;;  %v162_v9 = vld [vmem:[#allocation5] sm:$0x3]  ;;  %v242_v13 = vunpack.c.l.s4 %v541_v12  ;;  %v245_v16 = vshrl.u32 %v244_v14, 7  ;;  %vm344_vm2 = vcmask 1041409  }
  0x34   :  { %394 = vmatprep.subr.mxu1 %v539_v0  ;;  %382 = vmatpush3.msra.mxu0 %v79_v2  ;;  %v76_v8 = vld [vmem:[#allocation7] sm:$0xff]  ;;  %v585_v10 = vld [vmem:[#allocation2] sm:$0xff]  ;;  %v587_v11 = vld [vmem:[#allocation2 + $0x8] sm:$0xff]  ;;  %vm347_vm3 = vcmask 254976  }
  0x35   :  { %395 = vmatpush3.msra.mxu1 %v165_v3  ;;  %383 = vmatprep.subr.mxu0 %v78_v4  ;;  %v243_v15 = vunpack.c.0.s8 %v242_v13  ;;  %v265_v20 = vsub.s32 0, %v245_v16  ;;  %v369_v31 = vld [vmem:[%s610_s4] ss:$0 sm:$0xff]  ;;  %s542_s4 = smov [#allocation10]  }
  0x36   :  { %396 = vmatprep.subr.mxu1 %v539_v0  ;;  %384 = vmatpush3.msra.mxu0 %v78_v4  ;;  %s355_s13 = sshll.u32 %s542_s4, 4  ;;  %s356_s13 = int_to_ptr.vmem [resolvable:$true] %s355_s13 }
  0x37   :  { %397 = vmatpush3.msra.mxu1 %v164_v5  ;;  %385 = vmatprep.subr.mxu0 %v77_v6  ;;  %v246_v17 = vsub.s32 %v243_v15, %v245_v16  ;;  %s505_s14 = scalar_lea.vmem %s356_s13, 32  ;;  %p510_p7 = scmp.lt.s32.totalorder %s356_s13, %s356_s13 }
  0x38   :  { %398 = vmatprep.subr.mxu1 %v539_v0  ;;  %386 = vmatpush3.msra.mxu0 %v77_v6  ;;  %p506_p6 = scmp.ne.s32.totalorder %s356_s13, %s505_s14  ;;  %p511_p8 = scmp.lt.s32.totalorder %s505_s14, %s505_s14 }
  0x39   :  { %399 = vmatpush3.msra.mxu1 %v163_v7  ;;  %387 = vmatprep.subr.mxu0 %v76_v8 }
  0x3a   :  { %401 = vmatmul.mubr.msk.f32.vlgmr.msra.gmra.mxu1 %vm80_vm1, %v162_v9  ;;  %388 = vmatpush3.msra.mxu0 %v76_v8  ;;  %p512_p9 = por %p511_p8, %p510_p7 }
  0x3b   :  { %389 = vmatprep.mubr.msk.f32.mxu0 %vm80_vm1, %v585_v10 }
  0x3c   :  { %390 = vmatmul.mubr.msk.f32.vlgmr.msra.gmra.mxu0 %vm80_vm1, %v587_v11  ;;  %p513_p10 = pnand %p512_p9, %p506_p6 }
  0xfa   :  { %v236_v18 = vpop.f32.mrf.mxu1 }
  0xfb   :  { %v247_v19 = vrot.slane %v236_v18, %v246_v17 }
  0xfc   :  { %v391_v21 = vpop.f32.mrf.mxu0  ;;  %v402_v22 = vpop.f32.mrf.mxu1 }
  0xfd   :  { %v248_v23 = vcombine.high %v247_v19, %v247_v19  ;;  %v255_v24 = vrot.slane %v247_v19, %v246_v17 }
  0xfe   :  { %v153_v27 = vpop.f32.mrf.mxu0 }
  0xff   :  { %v262_v25 = vrot.slane %v248_v23, %v246_v17  ;;  %v266_v26 = vrot.slane %v255_v24, %v265_v20 }
 0x101   :  { %v270_v28 = vrot.slane %v262_v25, %v265_v20  ;;  %v273_v29 = vadd.f32 %v266_v26, %v153_v27 }
 0x103   :  { %v274_v30 = vadd.f32 %v391_v21, %v270_v28  ;;  %413 = vtanh.f32 %v273_v29 }
 0x105   :  { %415 = vtanh.f32 %v274_v30 }
 0x110   :  { %v414_v32 = vpop.eup %413 }
 0x111   :  { %v284_v33 = vmul.f32 %v414_v32, %v369_v31 }
 0x112   :  { %v416_v34 = vpop.eup %415 }
 0x113   :  { %v286_v35 = vsel %vm80_vm1, %v284_v33, 0.0  ;;  %v285_v36 = vmul.f32 %v416_v34, %v369_v31 }
 0x114   :  { %287 = vadd.xlane.f32.xlu0 %v286_v35 }
 0x115   :  { %v289_v37 = vsel %vm80_vm1, %v285_v36, 0.0 }
 0x118   :  { %290 = vadd.xlane.f32.xlu0 %v289_v37 }
 0x19d   :  { %v288_v38 = vpop.xlane.xlu0 %287 }
 0x19e   :  { %v292_v39 = vrot.slane %v288_v38, 4 }
 0x1a0   :  { %v293_v40 = vmax.f32 %v288_v38, %v292_v39 }
 0x1a1   :  { %v291_v41 = vpop.xlane.xlu0 %290 }
 0x1a2   :  { %v294_v42 = vrot.slane %v293_v40, 2  ;;  %v298_v43 = vrot.slane %v291_v41, 4 }
 0x1a4   :  { %v295_v44 = vmax.f32 %v293_v40, %v294_v42  ;;  %v299_v45 = vmax.f32 %v291_v41, %v298_v43 }
 0x1a6   :  { %v296_v46 = vrot.slane %v295_v44, 1  ;;  %v300_v47 = vrot.slane %v299_v45, 2 }
 0x1a8   :  { %v297_v48 = vmax.f32 %v295_v44, %v296_v46  ;;  %v301_v49 = vmax.f32 %v299_v45, %v300_v47 }
 0x1aa   :  { %v304_v50 = vsub.f32 %v288_v38, %v297_v48  ;;  %v302_v51 = vrot.slane %v301_v49, 1 }
 0x1ac   :  { %v306_v52 = vmul.f32 1.442695, %v304_v50  ;;  %v303_v53 = vmax.f32 %v301_v49, %v302_v51 }
 0x1ae   :  { %417 = vpow2.f32 %v306_v52  ;;  %v305_v54 = vsub.f32 %v291_v41, %v303_v53 }
 0x1b0   :  { %v308_v55 = vmul.f32 1.442695, %v305_v54 }
 0x1b2   :  { %419 = vpow2.f32 %v308_v55 }
 0x1bb   :  { %v418_v56 = vpop.eup %417 }
 0x1bc   :  { %v310_v57 = vrot.slane %v418_v56, 4 }
 0x1be   :  { %v311_v58 = vadd.f32 %v418_v56, %v310_v57 }
 0x1bf   :  { %v420_v59 = vpop.eup %419 }
 0x1c0   :  { %v316_v60 = vrot.slane %v420_v59, 4  ;;  %v312_v61 = vrot.slane %v311_v58, 2 }
 0x1c2   :  { %v317_v62 = vadd.f32 %v420_v59, %v316_v60  ;;  %v313_v63 = vadd.f32 %v312_v61, %v311_v58 }
 0x1c4   :  { %v314_v0 = vrot.slane %v313_v63, 1  ;;  %v318_v1 = vrot.slane %v317_v62, 2 }
 0x1c6   :  { %v315_v2 = vadd.f32 %v314_v0, %v313_v63  ;;  %v319_v3 = vadd.f32 %v318_v1, %v317_v62 }
 0x1c8   :  { %v320_v4 = vrot.slane %v319_v3, 1  ;;  %421 = vrcp.f32 %v315_v2 }
 0x1ca   :  { %v321_v5 = vadd.f32 %v320_v4, %v319_v3 }
 0x1cc   :  { %423 = vrcp.f32 %v321_v5 }
 0x1d5   :  { %v422_v6 = vpop.eup %421 }
 0x1d6   :  { %v324_v7 = vmul.f32 %v422_v6, %v418_v56 }
 0x1d8   :  { %v326_v8 = vmul.f32 %v324_v7, %v585_v10 }
 0x1d9   :  { %v424_v9 = vpop.eup %423 }
 0x1da   :  { %v325_v12 = vmul.f32 %v424_v9, %v420_v59  ;;  %v328_v13 = vsel %vm80_vm1, %v326_v8, 0.0 }
 0x1db   :  { %v329_v14 = vrot.slane %v328_v13, 4 }
 0x1dc   :  { %v327_v15 = vmul.f32 %v325_v12, %v587_v11 }
 0x1dd   :  { %v330_v16 = vadd.f32 %v329_v14, %v328_v13 }
 0x1de   :  { %v335_v17 = vsel %vm80_vm1, %v327_v15, 0.0 }
 0x1df   :  { %v331_v18 = vrot.slane %v330_v16, 2  ;;  %v336_v19 = vrot.slane %v335_v17, 4 }
 0x1e1   :  { %v332_v20 = vadd.f32 %v331_v18, %v330_v16  ;;  %v337_v21 = vadd.f32 %v336_v19, %v335_v17 }
 0x1e3   :  { %v338_v22 = vrot.slane %v337_v21, 2  ;;  %v333_v23 = vrot.slane %v332_v20, 1 }
 0x1e5   :  { %v339_v24 = vadd.f32 %v338_v22, %v337_v21  ;;  %v334_v10 = vadd.f32 %v333_v23, %v332_v20 }
 0x1e7   :  { %v340_v25 = vrot.slane %v339_v24, 1 }
 0x1e9   :  { %v341_v26 = vadd.f32 %v340_v25, %v339_v24 }
 0x1eb   :  { %v345_v27 = vsel %vm344_vm2, %v341_v26, %v334_v10 }
 0x1ec   :  { %348 = vst.msk [vmem:[#allocation10] sm:$0x3] %vm347_vm3, %v345_v27 }
 0x1ed   :  { %516 = shalt.err (!%p513_p10)
}
 0x1ee   :  { %358 = dma.vmem_to_hbm [thread:$0]  %s356_s13, 32, %s611_s5, [#allocation4]  }
 0x1ef   :  { %531 = dma.done.wait [#allocation4], 32  }
 0x1f0   :  { %532 = vsyncadd [#allocation4], 4294967264 }
 0x1f1   :  { %362 = vsyncpa [#allocation3], 1 }
 0x1f2   :  { %363 = vsyncpa [#allocation6], 1 }
 0x1f3   :  { %364 = vsyncpa [#allocation9], 1 }
 0x1f4   :  { %365 = vsyncpa [#allocation4], 1 }

</bundles_post_ra>
